<compile_context>
chip_gen: v6e
topology: v6e:2x2x1
jax: 0.10.0
libtpu: 0.0.40
codegen_flags: <defaults>
</compile_context>

<pallas_src>
import functools

import jax
import jax.numpy as jnp
from jax.experimental import pallas as pl
from jax.experimental.pallas import tpu as pltpu


# ---------------------------------------------------------------------------
# Kernel body
# ---------------------------------------------------------------------------
def transformer_block_kernel(x_ref, g2_ref, w13_ref, w2_ref, o_ref,
                             hn_ref, acc_ref, *, eps, tf):
    k = pl.program_id(1)
    n_f = pl.num_programs(1)

    # First F step for this token tile: compute RMSNorm2(x) once (f32 statistics),
    # cache it (in the compute/weight dtype) for the remaining F steps, and zero
    # the f32 FFN accumulator.
    @pl.when(k == 0)
    def _():
        x = x_ref[...].astype(jnp.float32)
        ms = jnp.mean(x * x, axis=-1, keepdims=True)
        hn = (x * jax.lax.rsqrt(ms + eps)) * g2_ref[...].astype(jnp.float32)
        hn_ref[...] = hn.astype(hn_ref.dtype)
        acc_ref[...] = jnp.zeros_like(acc_ref)

    # SwiGLU FFN over one block of the hidden dimension.  The fused [W1|W3] block is
    # (D, 2*tf): columns [:tf] are W1's block k, [tf:] are W3's block k.
    hn = hn_ref[...]
    ab = jnp.dot(hn, w13_ref[...], preferred_element_type=jnp.float32)   # (tm, 2*tf)
    a = ab[:, :tf]
    b = ab[:, tf:]
    gated = (a * jax.nn.sigmoid(a)) * b                                  # silu(a) * b
    acc_ref[...] += jnp.dot(gated.astype(w2_ref.dtype), w2_ref[...],
                            preferred_element_type=jnp.float32)          # (tm, D)

    # Last F step: add the residual (h == x, since the attention branch is zero)
    # and write the lane-dense output tile once.
    @pl.when(k == n_f - 1)
    def _():
        o_ref[...] = (x_ref[...].astype(jnp.float32) + acc_ref[...]).astype(o_ref.dtype)


# ---------------------------------------------------------------------------
# Generation-aware sizing helpers
# ---------------------------------------------------------------------------
def _vmem_capacity_bytes():
    """Per-TensorCore VMEM capacity; conservative 64 MiB (v7x) if unknown."""
    try:
        info = pltpu.get_tpu_info()
        cap = getattr(info, "vmem_capacity_bytes", None)
        if cap:
            return int(cap)
    except Exception:
        pass
    return 64 * 1024 * 1024


def _working_set_bytes(tm, tf, D, x_bytes, w_bytes):
    """Double-buffered streamed tiles + resident scratch for one grid step."""
    stream = 2 * (tm * D * x_bytes          # x tile
                  + tm * D * x_bytes        # out tile
                  + 2 * tf * D * w_bytes    # fused [W1|W3] column block
                  + tf * D * w_bytes)       # W2 row block
    scratch = tm * D * (w_bytes + 4)        # hn cache + f32 accumulator
    return stream + scratch + 2 * D * x_bytes   # + norm2 weight (tiny)


def _pick_tiles(N, D, F, x_bytes, w_bytes, budget):
    """Largest token tile first (arithmetic intensity ~ tm since weights re-stream
    once per token tile), then the largest F tile that fits the VMEM budget."""
    tm_candidates = [1024, 768, 512, 384, 256, 128, 64, 32, 16, 8]
    tf_candidates = [512, 384, 256, 128]
    for tm in tm_candidates:
        if tm > N or N % tm:
            continue
        for tf in tf_candidates:
            if tf > F or F % tf:
                continue
            if _working_set_bytes(tm, tf, D, x_bytes, w_bytes) <= budget:
                return tm, tf
    # Fallback for awkward shapes: smallest aligned tiles (or the full extent).
    return (8 if N % 8 == 0 else N), (128 if F % 128 == 0 else F)


# ---------------------------------------------------------------------------
# Wrapper
# ---------------------------------------------------------------------------
def transformer_block(x, g2, w1_t, w3_t, w2_t, *, eps=1e-5, tm=None, tf=None,
                      compute_dtype=jnp.bfloat16):
    """x: (N, D) tokens; g2: (1, D) RMSNorm2 weight; w1_t/w3_t: (D, F); w2_t: (F, D)
    (weights pre-transposed to (in, out)).  Weights are cast to `compute_dtype`
    (bf16 by default) for the MXU; accumulation stays f32."""
    N, D = x.shape
    Dw, F = w1_t.shape
    assert Dw == D and w3_t.shape == (D, F) and w2_t.shape == (F, D)
    assert g2.shape == (1, D)

    x_bytes = jnp.dtype(x.dtype).itemsize
    w_bytes = jnp.dtype(compute_dtype).itemsize

    vmem_cap = _vmem_capacity_bytes()
    if tm is None or tf is None:
        auto_tm, auto_tf = _pick_tiles(N, D, F, x_bytes, w_bytes,
                                       budget=int(vmem_cap * 0.80))
        tm = auto_tm if tm is None else tm
        tf = auto_tf if tf is None else tf
    assert N % tm == 0 and F % tf == 0
    assert D % 128 == 0 and tf % 128 == 0, "lane-dense blocks required"

    ws = _working_set_bytes(tm, tf, D, x_bytes, w_bytes)
    # Generation-aware limit: generous margin, but never above ~92% of the chip's
    # physical VMEM (64 MiB on v7x, 128 MiB on v5e/v6e).
    vmem_limit = int(min(max(int(ws * 1.5), 32 * 1024 * 1024), vmem_cap * 0.92))

    # Fuse W1 / W3 into one interleaved (D, 2F) weight so that column block k of
    # width 2*tf is [W1[:, k*tf:(k+1)*tf] | W3[:, k*tf:(k+1)*tf]].
    kf = F // tf
    w13 = jnp.concatenate(
        [w1_t.astype(compute_dtype).reshape(D, kf, tf),
         w3_t.astype(compute_dtype).reshape(D, kf, tf)],
        axis=2,
    ).reshape(D, 2 * F)
    w2c = w2_t.astype(compute_dtype)

    grid = (N // tm, F // tf)
    kernel = functools.partial(transformer_block_kernel, eps=eps, tf=tf)

    cost = pl.CostEstimate(
        flops=6 * N * D * F,                         # three matmuls, 2*N*D*F each
        transcendentals=N * F,                       # sigmoid inside silu
        bytes_accessed=(2 * N * D * x_bytes          # x in + out
                        + (N // tm) * 3 * D * F * w_bytes   # weights re-streamed
                        + D * 4))                    # norm2 weight

    return pl.pallas_call(
        kernel,
        out_shape=jax.ShapeDtypeStruct((N, D), x.dtype),
        grid_spec=pltpu.PrefetchScalarGridSpec(
            num_scalar_prefetch=0,
            grid=grid,
            in_specs=[
                pl.BlockSpec((tm, D), lambda i, k: (i, 0)),       # x tile (constant over k)
                pl.BlockSpec((1, D), lambda i, k: (0, 0)),        # norm2 weight
                pl.BlockSpec((D, 2 * tf), lambda i, k: (0, k)),   # fused [W1|W3] block
                pl.BlockSpec((tf, D), lambda i, k: (k, 0)),       # W2 row block
            ],
            out_specs=pl.BlockSpec((tm, D), lambda i, k: (i, 0)),
            scratch_shapes=[
                pltpu.VMEM((tm, D), compute_dtype),   # cached RMSNorm2(x)
                pltpu.VMEM((tm, D), jnp.float32),     # f32 FFN accumulator
            ],
        ),
        compiler_params=pltpu.CompilerParams(
            dimension_semantics=("parallel", "arbitrary"),
            vmem_limit_bytes=vmem_limit),
        cost_estimate=cost,
    )(x, g2, w13, w2c)


# ---------------------------------------------------------------------------
# Pure-JAX reference of the PyTorch forward (eval mode)
# ---------------------------------------------------------------------------
def reference(x, g2, w1_t, w3_t, w2_t, eps=1e-5):
    h = x  # attention placeholder returns out_proj(zeros) == 0; dropout is identity
    hn = h * jax.lax.rsqrt(jnp.mean(h * h, -1, keepdims=True) + eps) * g2
    ffn = (jax.nn.silu(hn @ w1_t) * (hn @ w3_t)) @ w2_t
    return h + ffn


if __name__ == "__main__":
    # Small shapes consistent with the module's structure (d_ffn = 4 * d_model),
    # lane-dense (D, F multiples of 128): batch=2, seq=64, d_model=128, d_ffn=512.
    B, S, D, Fd = 2, 64, 128, 512
    eps = 1e-5

    key = jax.random.PRNGKey(0)
    kx, k1, k2, k3 = jax.random.split(key, 4)

    x = jax.random.normal(kx, (B, S, D), dtype=jnp.float32)
    g2 = jnp.ones((1, D), dtype=jnp.float32)   # RMSNorm weight init == ones

    # Linear weights (deterministic synthetic init), stored pre-transposed (in, out).
    w1_t = jax.random.normal(k1, (D, Fd), dtype=jnp.float32) * 0.05
    w3_t = jax.random.normal(k2, (D, Fd), dtype=jnp.float32) * 0.05
    w2_t = jax.random.normal(k3, (Fd, D), dtype=jnp.float32) * 0.05

    x2d = x.reshape(B * S, D)
    # Explicit small tiles so the demo exercises a non-trivial (2, 4) grid with
    # F-axis accumulation; at real model sizes the generation-aware defaults apply.
    out2d = transformer_block(x2d, g2, w1_t, w3_t, w2_t, eps=eps, tm=64, tf=128)
    out = out2d.reshape(B, S, D)
    jax.block_until_ready(out)

    # Reference uses the same bf16-quantized weights; the kernel keeps hn/gated in
    # bf16 with f32 accumulation, so compare at bf16-appropriate tolerance.
    def q(w):
        return w.astype(jnp.bfloat16).astype(jnp.float32)

    ref = reference(x2d, g2, q(w1_t), q(w3_t), q(w2_t), eps=eps).reshape(B, S, D)
    assert jnp.allclose(out.astype(jnp.float32), ref, atol=3e-2, rtol=3e-2), \
        "mismatch vs reference"

    print("KERNEL_OK")
</pallas_src>

<mosaic_0001>
module attributes {stable_mosaic.version = 11 : i64} {
  func.func @transformer_block_kernel(%arg0: i32, %arg1: i32, %arg2: memref<64x128xf32, #tpu.memory_space<vmem>>, %arg3: memref<1x128xf32, #tpu.memory_space<vmem>>, %arg4: memref<128x256xbf16, #tpu.memory_space<vmem>>, %arg5: memref<128x128xbf16, #tpu.memory_space<vmem>>, %arg6: memref<64x128xf32, #tpu.memory_space<vmem>>, %arg7: memref<64x128xbf16, #tpu.memory_space<vmem>>, %arg8: memref<64x128xf32, #tpu.memory_space<vmem>>) attributes {dimension_semantics = [#tpu.dimension_semantics<parallel>, #tpu.dimension_semantics<arbitrary>], iteration_bounds = array<i64: 2, 4>, scalar_prefetch = 0 : i64, scratch_operands = 2 : i64, tpu.core_type = #tpu.core_type<tc>, window_params = [{transform_indices = @transform_0, window_bounds = array<i64: 64, 128>}, {pipeline_mode = #tpu.pipeline_mode<synchronous>, transform_indices = @transform_1, window_bounds = array<i64: 1, 128>}, {transform_indices = @transform_2, window_bounds = array<i64: 128, 256>}, {transform_indices = @transform_3, window_bounds = array<i64: 128, 128>}, {transform_indices = @transform_4, window_bounds = array<i64: 64, 128>}]} {
    %c0_i32 = arith.constant 0 : i32
    %0 = arith.cmpi eq, %arg1, %c0_i32 : i32
    %1 = arith.extui %0 : i1 to i32
    %c0_i32_0 = arith.constant 0 : i32
    %2 = arith.cmpi ne, %1, %c0_i32_0 : i32
    scf.if %2 {
      %c0_13 = arith.constant 0 : index
      %c0_14 = arith.constant 0 : index
      %24 = vector.load %arg2[%c0_13, %c0_14] : memref<64x128xf32, #tpu.memory_space<vmem>>, vector<64x128xf32>
      %25 = arith.mulf %24, %24 : vector<64x128xf32>
      %cst_15 = arith.constant dense<0.000000e+00> : vector<64xf32>
      %26 = vector.multi_reduction <add>, %25, %cst_15 [1] : vector<64x128xf32> to vector<64xf32>
      %27 = vector.shape_cast %26 : vector<64xf32> to vector<64x1xf32>
      %cst_16 = arith.constant 1.280000e+02 : f32
      %28 = vector.broadcast %cst_16 : f32 to vector<64x1xf32>
      %29 = arith.divf %27, %28 : vector<64x1xf32>
      %cst_17 = arith.constant 9.99999974E-6 : f32
      %30 = vector.broadcast %cst_17 : f32 to vector<64x1xf32>
      %31 = arith.addf %29, %30 : vector<64x1xf32>
      %32 = math.rsqrt %31 : vector<64x1xf32>
      %33 = vector.broadcast %32 : vector<64x1xf32> to vector<64x128xf32>
      %34 = arith.mulf %24, %33 : vector<64x128xf32>
      %c0_18 = arith.constant 0 : index
      %c0_19 = arith.constant 0 : index
      %35 = vector.load %arg3[%c0_18, %c0_19] : memref<1x128xf32, #tpu.memory_space<vmem>>, vector<1x128xf32>
      %36 = vector.broadcast %35 : vector<1x128xf32> to vector<64x128xf32>
      %37 = arith.mulf %34, %36 : vector<64x128xf32>
      %38 = arith.truncf %37 : vector<64x128xf32> to vector<64x128xbf16>
      %c0_20 = arith.constant 0 : index
      %c0_21 = arith.constant 0 : index
      %39 = vector.load %arg7[%c0_20, %c0_21] : memref<64x128xbf16, #tpu.memory_space<vmem>>, vector<64x128xbf16>
      tpu.vector_store %arg7[%c0_20, %c0_21], %38 {strides = array<i32>} : memref<64x128xbf16, #tpu.memory_space<vmem>>, vector<64x128xbf16>,
      %cst_22 = arith.constant 0.000000e+00 : f32
      %40 = vector.broadcast %cst_22 : f32 to vector<64x128xf32>
      %c0_23 = arith.constant 0 : index
      %c0_24 = arith.constant 0 : index
      %41 = vector.load %arg8[%c0_23, %c0_24] : memref<64x128xf32, #tpu.memory_space<vmem>>, vector<64x128xf32>
      tpu.vector_store %arg8[%c0_23, %c0_24], %40 {strides = array<i32>} : memref<64x128xf32, #tpu.memory_space<vmem>>, vector<64x128xf32>,
    } else {
    }
    %c0 = arith.constant 0 : index
    %c0_1 = arith.constant 0 : index
    %3 = vector.load %arg7[%c0, %c0_1] : memref<64x128xbf16, #tpu.memory_space<vmem>>, vector<64x128xbf16>
    %c0_2 = arith.constant 0 : index
    %c0_3 = arith.constant 0 : index
    %4 = vector.load %arg4[%c0_2, %c0_3] : memref<128x256xbf16, #tpu.memory_space<vmem>>, vector<128x256xbf16>
    %cst = arith.constant dense<0.000000e+00> : vector<64x256xf32>
    %5 = tpu.matmul %3, %4, %cst {dimension_numbers = #tpu.dot_dimension_numbers<[1], [0], [0], [1], [0, 0, 1, 1], [], []>} : vector<64x128xbf16>, vector<128x256xbf16>, vector<64x256xf32> -> vector<64x256xf32>
    %6 = vector.extract_strided_slice %5 {offsets = [0, 0], sizes = [64, 128], strides = [1, 1]} : vector<64x256xf32> to vector<64x128xf32>
    %7 = vector.extract_strided_slice %5 {offsets = [0, 128], sizes = [64, 128], strides = [1, 1]} : vector<64x256xf32> to vector<64x128xf32>
    %8 = arith.negf %6 : vector<64x128xf32>
    %9 = math.exp %8 : vector<64x128xf32>
    %cst_4 = arith.constant 1.000000e+00 : f32
    %10 = vector.broadcast %cst_4 : f32 to vector<64x128xf32>
    %11 = arith.addf %10, %9 : vector<64x128xf32>
    %12 = arith.divf %10, %11 : vector<64x128xf32>
    %13 = arith.mulf %6, %12 : vector<64x128xf32>
    %14 = arith.mulf %13, %7 : vector<64x128xf32>
    %c0_5 = arith.constant 0 : index
    %c0_6 = arith.constant 0 : index
    %15 = vector.load %arg8[%c0_5, %c0_6] : memref<64x128xf32, #tpu.memory_space<vmem>>, vector<64x128xf32>
    %16 = arith.truncf %14 : vector<64x128xf32> to vector<64x128xbf16>
    %c0_7 = arith.constant 0 : index
    %c0_8 = arith.constant 0 : index
    %17 = vector.load %arg5[%c0_7, %c0_8] : memref<128x128xbf16, #tpu.memory_space<vmem>>, vector<128x128xbf16>
    %cst_9 = arith.constant dense<0.000000e+00> : vector<64x128xf32>
    %18 = tpu.matmul %16, %17, %cst_9 {dimension_numbers = #tpu.dot_dimension_numbers<[1], [0], [0], [1], [0, 0, 1, 1], [], []>} : vector<64x128xbf16>, vector<128x128xbf16>, vector<64x128xf32> -> vector<64x128xf32>
    %19 = arith.addf %15, %18 : vector<64x128xf32>
    %c0_10 = arith.constant 0 : index
    %c0_11 = arith.constant 0 : index
    %20 = vector.load %arg8[%c0_10, %c0_11] : memref<64x128xf32, #tpu.memory_space<vmem>>, vector<64x128xf32>
    tpu.vector_store %arg8[%c0_10, %c0_11], %19 {strides = array<i32>} : memref<64x128xf32, #tpu.memory_space<vmem>>, vector<64x128xf32>,
    %c3_i32 = arith.constant 3 : i32
    %21 = arith.cmpi eq, %arg1, %c3_i32 : i32
    %22 = arith.extui %21 : i1 to i32
    %c0_i32_12 = arith.constant 0 : i32
    %23 = arith.cmpi ne, %22, %c0_i32_12 : i32
    scf.if %23 {
      %c0_13 = arith.constant 0 : index
      %c0_14 = arith.constant 0 : index
      %24 = vector.load %arg2[%c0_13, %c0_14] : memref<64x128xf32, #tpu.memory_space<vmem>>, vector<64x128xf32>
      %c0_15 = arith.constant 0 : index
      %c0_16 = arith.constant 0 : index
      %25 = vector.load %arg8[%c0_15, %c0_16] : memref<64x128xf32, #tpu.memory_space<vmem>>, vector<64x128xf32>
      %26 = arith.addf %24, %25 : vector<64x128xf32>
      %c0_17 = arith.constant 0 : index
      %c0_18 = arith.constant 0 : index
      %27 = vector.load %arg6[%c0_17, %c0_18] : memref<64x128xf32, #tpu.memory_space<vmem>>, vector<64x128xf32>
      tpu.vector_store %arg6[%c0_17, %c0_18], %26 {strides = array<i32>} : memref<64x128xf32, #tpu.memory_space<vmem>>, vector<64x128xf32>,
    } else {
    }
    return
  }
  func.func @transform_0(%arg0: i32, %arg1: i32) -> (i32, i32) {
    %c0_i32 = arith.constant 0 : i32
    %c0_i32_0 = arith.constant 0 : i32
    return %arg0, %c0_i32 : i32, i32
  }
  func.func @transform_1(%arg0: i32, %arg1: i32) -> (i32, i32) {
    %c0_i32 = arith.constant 0 : i32
    %c0_i32_0 = arith.constant 0 : i32
    %c0_i32_1 = arith.constant 0 : i32
    return %c0_i32, %c0_i32_0 : i32, i32
  }
  func.func @transform_2(%arg0: i32, %arg1: i32) -> (i32, i32) {
    %c0_i32 = arith.constant 0 : i32
    %c0_i32_0 = arith.constant 0 : i32
    return %c0_i32, %arg1 : i32, i32
  }
  func.func @transform_3(%arg0: i32, %arg1: i32) -> (i32, i32) {
    %c0_i32 = arith.constant 0 : i32
    %c0_i32_0 = arith.constant 0 : i32
    return %arg1, %c0_i32 : i32, i32
  }
  func.func @transform_4(%arg0: i32, %arg1: i32) -> (i32, i32) {
    %c0_i32 = arith.constant 0 : i32
    %c0_i32_0 = arith.constant 0 : i32
    return %arg0, %c0_i32 : i32, i32
  }
}

</mosaic_0001>

<bundles_post_ra>
// kernel: tpu_custom_call.1
= control target key start
LH: loop header
LB: loop body
LE: loop exit
PB: predicated region body
PF: predicated region fallthrough
CT: control target
= control target key end

     0   :  { %s2019_s0 = inlined_call_operand.hbm [shape: f32[128,128], index: 0, kind: input, shape index: {}]   ;;  %s2020_s1 = inlined_call_operand.vmem [shape: f32[1,128], index: 1, kind: input, shape index: {}]   ;;  %s2021_s2 = inlined_call_operand.hbm [shape: bf16[128,1024], index: 2, kind: input, shape index: {}]   ;;  %s2022_s3 = inlined_call_operand.hbm [shape: bf16[512,128], index: 3, kind: input, shape index: {}]   ;;  %s2023_s4 = inlined_call_operand.hbm [shape: f32[128,128], index: 4, kind: output, shape index: {}]  }
   0x1   :  { %2037 = sst [smem:[#allocation23_spill]] %s2019_s0 }
   0x2   :  { %2038 = sst [smem:[#allocation24_spill]] %s2021_s2 }
   0x3   :  { %2039 = sst [smem:[#allocation25_spill]] %s2023_s4 }
   0x4   :  { %9 = vsyncpa [#allocation5], 0 }
   0x5   :  { %11 = vsyncpa [#allocation5 + $0x1], 0 }
   0x6   :  { %12 = vsyncpa [#allocation8], 0 }
   0x7   :  { %14 = vsyncpa [#allocation8 + $0x1], 0 }
   0x8   :  { %15 = vsyncpa [#allocation6], 0 }
   0x9   :  { %17 = vsyncpa [#allocation6 + $0x1], 0  ;;  %s1635_s15 = smov 0   ;;  %s1637_s16 = smov 0  }
   0xa   :  { %s1639_s17 = smov 0   ;;  %s1641_s18 = smov 0  }
   0xb   :  { %s1643_s19 = smov 0   ;;  %s1645_s20 = smov 0  }
   0xc   :  { %s1647_s21 = smov 0   ;;  %s1649_s22 = smov 0  }
   0xd   :  { %s1651_s23 = smov 0   ;;  %s1653_s24 = smov 0  }
   0xe   :  { %s1655_s25 = smov 0  }
   0xf LB: > { %2040 = sst [smem:[#allocation14_spill]] %s1563_s17  ;;  %s32_s26 = sadd.s32 1, %s1587_s23  ;;  %s1595_s25 = sphi %s1655_s25, %s23_s25   ;;  %s1591_s24 = sphi %s1653_s24, %s2082_s24   ;;  %s1587_s23 = sphi %s1651_s23, %s2081_s23   ;;  %s1583_s22 = sphi %s1649_s22, %s2073_s22   ;;  %s1579_s21 = sphi %s1647_s21, %s2080_s21   ;;  %s1575_s20 = sphi %s1645_s20, %s2072_s20   ;;  %s1571_s19 = sphi %s1643_s19, %s2079_s19   ;;  %s1567_s18 = sphi %s1641_s18, %s2078_s18   ;;  %s1563_s17 = sphi %s1639_s17, %s2070_s17   ;;  %s1559_s16 = sphi %s1637_s16, %s2077_s16   ;;  %s1555_s15 = sphi %s1635_s15, %s2076_s15  }
  0x10   : > { %2041 = sst [smem:[#allocation15_spill]] %s1575_s20  ;;  %p50_p0 = scmp.eq.s32.totalorder %s1595_s25, 0 }
  0x11   : > { %2042 = sst [smem:[#allocation16_spill]] %s1583_s22  ;;  %p1692_p1 = scmp.ge.s32.totalorder %s32_s26, 4 }
  0x12   : > { %2043 = sst [smem:[#allocation17_spill]] %s1591_s24  ;;  %s89_s28 = sadd.s32 1, %s1563_s17 }
  0x13   : > { %p96_p2 = scmp.ne.s32.totalorder %s1563_s17, %s1559_s16  ;;  %p102_p3 = scmp.ne.s32.totalorder %s1559_s16, %s1555_s15 }
  0x14   : > { %s2084_s26 = smov (%p1692_p1, %s32_s26), 0  ;;  %p2029_p5 = scmp.lt.s32.totalorder %s1595_s25, 8 }
  0x15   : > { %2045 = sst [smem:[#allocation18_spill]] %s2084_s26  ;;  %p98_p4 = por %p96_p2, %p50_p0 }
  0x16   : > { %s86_s29 = ssub.s32 %s1587_s23, %s2084_s26  ;;  %s202_s30 = sand.u32 1, %s1595_s25  }
  0x17   : > { %p87_p6 = scmp.eq.s32.totalorder %s86_s29, 0  ;;  %s2024_s6 = sand.u32 1, %s1563_s17  }
  0x18   : > { %s1048_s7 = sshll.u32 %s2024_s6, 7  ;;  %s1112_s8 = sshll.u32 %s1587_s23, 7 }
  0x19   : > { %s1712_s5 = scalar_select %p87_p6, %s1563_s17, %s89_s28  }
  0x1a   : > { %s2047_s2 = sld [smem:[#allocation24_spill]]  ;;  %s206_s12 = scalar_lea.vmem [#allocation7], %s1048_s7 }
  0x1b   : > { %2046 = sst [smem:[#allocation19_spill]] %s1712_s5  ;;  %s213_s13 = sshll.u32 %s206_s12, 4  ;;  %s214_s13 = int_to_ptr.vmem [resolvable:$true] %s213_s13 }
  0x1c   : > { %p1723_p7 = pnand %p2029_p5, %p98_p4  ;;  %p1054_p8 = scmp.ge.s32.totalorder %s1595_s25, 1 }
  0x1d   : > { %s1728_s28 = scalar_lea.sflag [#allocation8], %s202_s30  ;;  %s1400_s29 = scalar_lea.vmem %s214_s13, 2048 }
  0x1e   : > { %p2026_p9 = pneg %p1723_p7  ;;  %p1401_p10 = scmp.ne.s32.totalorder %s214_s13, %s1400_s29 }
  0x1f   : > { %s1597_s7 = smov [#allocation7]  }
  0x20   : > { %s212_s11 = scalar_lea.hbm %s2047_s2, %s1112_s8  ;;  %p1403_p11 = pnand %p1401_p10, %p2026_p9 }
  0x21   : > { %s1405_s8 = sshll.u32 %s1597_s7, 4  ;;  %s1406_s8 = int_to_ptr.vmem [resolvable:$false] %s1405_s8 }
  0x22   : > { %p1404_p12 = pneg %p1403_p11  ;;  %s1407_s9 = scalar_lea.vmem %s1406_s8, 4096 }
  0x23   : > { %p1408_p13 = scmp.lt.s32.totalorder %s214_s13, %s1406_s8  ;;  %p1409_p2 = scmp.lt.s32.totalorder %s1407_s9, %s1400_s29 }
  0x25   : > { %p1410_p4 = por %p1409_p2, %p1408_p13 }
  0x27   : > { %p1411_p6 = pnand %p1410_p4, %p1404_p12 }
  0x29   : > { %1414 = shalt.err (!%p1411_p6)
}
  0x2a   : > { %s1598_s10 = smov 512   ;;  %s2025_s30 = smov 128  }
  0x2b   : > { %s2027_s12 = smov 8   ;;  %p242_p10 = scmp.lt.s32.totalorder %s1595_s25, 9 }
  0x2c   : > { %1196 = dma.hbm_to_vmem [thread:$0]  (!%p1723_p7), %s212_s11, 2048, %s214_s13, %s1728_s28, %s1598_s10, %s2025_s30, %s2027_s12  }
  0x2d   : > { %p1743_p11 = pnand %p1054_p8, %p242_p10  ;;  %s1748_s7 = sadd.s32 4294967295, %s1595_s25  }
  0x2e   : > { %s1042_s8 = sadd.s32 4294967294, %s1595_s25   ;;  %s35_s9 = sadd.s32 1, %s1591_s24 }
  0x2f   : > { %s42_s6 = sadd.s32 1, %s1575_s20  ;;  %s2086_s9 = smov (!%p1692_p1, %s35_s9), %s1591_s24 }
  0x30   : > { %p49_p12 = scmp.ne.s32.totalorder %s1575_s20, %s1571_s19  ;;  %p55_p13 = scmp.ne.s32.totalorder %s1571_s19, %s1567_s18 }
  0x31   : > { %p37_p8 = scmp.ge.s32.totalorder %s2086_s9, 2  ;;  %p56_p2 = scmp.eq.s32.totalorder %s1748_s7, 0 }
  0x32   : > { %p1763_p4 = por %p50_p0, %p49_p12  ;;  %p152_p6 = scmp.eq.s32.totalorder %s1748_s7, 7 }
  0x33   : > { %s2088_s9 = smov (%p37_p8, %s2086_s9), 0  ;;  %p1773_p1 = por %p56_p2, %p55_p13 }
  0x34   : > { %2051 = sst [smem:[#allocation20_spill]] %s2088_s9  ;;  %p1780_p10 = por %p102_p3, %p56_p2 }
  0x35   : > { %s39_s10 = ssub.s32 %s1591_s24, %s2088_s9  ;;  %p1786_p0 = por %p152_p6, %p49_p12 }
  0x36   : > { %p40_p9 = scmp.eq.s32.totalorder %s39_s10, 0  ;;  %p158_p8 = scmp.eq.s32.totalorder %s1042_s8, 7 }
  0x37   : > { %s2054_s30 = scalar_select %p1786_p0, 1, 0 }
  0x38   : > { %s181_s12 = sand.u32 1, %s1575_s20   ;;  %s1111_s2 = sshll.u32 %s1591_s24, 10 }
  0x39   : > { %2055 = sst [smem:[#allocation21_spill]] %s2054_s30  ;;  %p1798_p5 = por %p158_p8, %p55_p13 }
  0x3a   : > { %s1793_s26 = scalar_select %p40_p9, %s1575_s20, %s42_s6  }
  0x3b   : > { %s2057_s5 = scalar_select %p1798_p5, 1, 0 }
  0x3c   : > { %2056 = sst [smem:[#allocation22_spill]] %s1793_s26  ;;  %s1045_s15 = sshll.u32 %s181_s12, 6 }
  0x3d   : > { %s2058_s0 = sld [smem:[#allocation23_spill]]  ;;  %p2059_p3 = scmp.lt.s32.totalorder %s1595_s25, 8 }
  0x3e   : > { %s185_s8 = scalar_lea.vmem [#allocation4], %s1045_s15  ;;  %s2061_s10 = sand.u32 1, %s1563_s17  }
  0x3f   : > { %p1809_p12 = pnand %p2059_p3, %p1763_p4  ;;  %s192_s6 = sshll.u32 %s185_s8, 4  ;;  %s193_s6 = int_to_ptr.vmem [resolvable:$true] %s192_s6 }
  0x40   : > { %s1051_s24 = sshll.u32 %s2061_s10, 6  ;;  %s182_s26 = scalar_lea.sflag [#allocation5], %s181_s12 }
  0x41   : > { %p1417_p9 = pneg %p1809_p12  ;;  %s1428_s20 = scalar_lea.vmem %s193_s6, 1024 }
  0x42   : > { %p1429_p13 = scmp.ne.s32.totalorder %s193_s6, %s1428_s20 }
  0x43   : > { %s191_s9 = scalar_lea.hbm %s2058_s0, %s1111_s2  ;;  %s1601_s2 = smov [#allocation4]  }
  0x44   : > { %p1431_p2 = pnand %p1429_p13, %p1417_p9  ;;  %s1433_s4 = sshll.u32 %s1601_s2, 4  ;;  %s1434_s4 = int_to_ptr.vmem [resolvable:$false] %s1433_s4 }
  0x45   : > { %s1435_s22 = scalar_lea.vmem %s1434_s4, 2048  ;;  %p1436_p4 = scmp.lt.s32.totalorder %s193_s6, %s1434_s4 }
  0x46   : > { %p1432_p6 = pneg %p1431_p2  ;;  %p1437_p8 = scmp.lt.s32.totalorder %s1435_s22, %s1428_s20 }
  0x48   : > { %p1438_p3 = por %p1437_p8, %p1436_p4 }
  0x4a   : > { %p1439_p5 = pnand %p1438_p3, %p1432_p6 }
  0x4c   : > { %1442 = shalt.err (!%p1439_p5)
}
  0x4d   : > { %s2062_s11 = smov 8   ;;  %s2063_s15 = smov 128  }
  0x4e   : > { %1193 = dma.hbm_to_vmem [thread:$0]  (!%p1809_p12), %s191_s9, 1024, %s193_s6, %s182_s26, %s2063_s15, %s2063_s15, %s2062_s11  }
  0x4f   : > { %s1113_s12 = sshll.u32 %s1587_s23, 10  ;;  %s227_s0 = scalar_lea.vmem [#allocation9], %s1051_s24 }
  0x50   : > { %s233_s2 = scalar_lea.hbm %s2022_s3, %s1113_s12  ;;  %s234_s17 = sshll.u32 %s227_s0, 4  ;;  %s235_s17 = int_to_ptr.vmem [resolvable:$true] %s234_s17 }
  0x51   : > { %s1456_s20 = scalar_lea.vmem %s235_s17, 1024  ;;  %p2064_p5 = pneg %p1723_p7 }
  0x52   : > { %p1457_p9 = scmp.ne.s32.totalorder %s235_s17, %s1456_s20  ;;  %s1602_s30 = smov [#allocation9]  }
  0x53   : > { %s1461_s4 = sshll.u32 %s1602_s30, 4  ;;  %s1462_s4 = int_to_ptr.vmem [resolvable:$false] %s1461_s4 }
  0x54   : > { %p1459_p13 = pnand %p1457_p9, %p2064_p5  ;;  %s1463_s22 = scalar_lea.vmem %s1462_s4, 2048 }
  0x55   : > { %p1464_p6 = scmp.lt.s32.totalorder %s235_s17, %s1462_s4  ;;  %p1465_p12 = scmp.lt.s32.totalorder %s1463_s22, %s1456_s20 }
  0x56   : > { %p1460_p2 = pneg %p1459_p13 }
  0x57   : > { %p1466_p4 = por %p1465_p12, %p1464_p6 }
  0x59   : > { %p1467_p8 = pnand %p1466_p4, %p1460_p2 }
  0x5b   : > { %1470 = shalt.err (!%p1467_p8)
}
  0x5c   : > { %s1603_s26 = smov 64   ;;  %s1604_s0 = smov 4  }
  0x5d   : > { %1199 = dma.hbm_to_vmem [thread:$0]  (!%p1723_p7), %s233_s2, 1024, %s235_s17, %s1728_s28, %s1603_s26, %s1603_s26, %s1604_s0  }
  0x5e   : > { %246 = sbr.rel (%p1743_p11) target bundleno = 821 (0x335), region = 36  ;;  %s1835_s24 = sand.u32 (!%p1743_p11), 1, %s1571_s19  }
  0x5f   : > { %s1055_s9 = sshll.u32 (!%p1743_p11), %s1835_s24, 6  ;;  %s249_s6 = scalar_lea.sflag (!%p1743_p11), [#allocation5], %s1835_s24 }
  0x60   : > { %s1839_s11 = scalar_lea.vmem (!%p1743_p11), [#allocation4], %s1055_s9 }
  0x63   : > { %1542 = dma.done.wait (%p1773_p1), %s249_s6, 1024  }
  0x64   : > { %1544 = vsyncadd (%p1773_p1), %s249_s6, 4294966272  ;;  %s257_s17 = sand.u32 1, %s1748_s7   ;;  %s259_s14 = sand.u32 1, %s1559_s16  }
  0x65   : > { %s1056_s28 = sshll.u32 %s259_s14, 7  ;;  %s258_s29 = scalar_lea.sflag [#allocation8], %s257_s17 }
  0x66   : > { %s1847_s15 = scalar_lea.vmem [#allocation7], %s1056_s28 }
  0x67   : > { %1546 = dma.done.wait (%p1780_p10), %s258_s29, 3072  }
  0x68   : > { %1548 = vsyncadd (%p1780_p10), %s258_s29, 4294964224  ;;  %s1057_s12 = sshll.u32 %s259_s14, 6  ;;  %s1855_s10 = scalar_lea.vmem [#allocation10], %s1055_s9 }
  0x69   : > { %s1853_s8 = scalar_lea.vmem [#allocation9], %s1057_s12  ;;  %p1059_p7 = scmp.ne.s32.totalorder %s1579_s21, 0 }
  0x6b   : > { %313 = sbr.rel (%p1059_p7) target bundleno = 291 (0x123), region = 52 }
  0x70   : > { %v1859_v0 = vld [vmem:[%s1839_s11 + $0x10] sm:$0xff]  ;;  %v1862_v1 = vld [vmem:[%s1839_s11] sm:$0xff]  ;;  %v1865_v2 = vld [vmem:[%s1839_s11 + $0x18] sm:$0xff]  ;;  %v1605_v16 = vmov 0.0  }
  0x71   : > { %v324_v3 = vmul.f32 %v1859_v0, %v1859_v0  ;;  %v322_v4 = vmul.f32 %v1862_v1, %v1862_v1  ;;  %v1872_v5 = vld [vmem:[%s1839_s11 + $0x8] sm:$0xff]  ;;  %v325_v6 = vmul.f32 %v1865_v2, %v1865_v2  ;;  %v1882_v9 = vld [vmem:[%s1839_s11 + $0x20] sm:$0xff]  ;;  %v1889_v12 = vld [vmem:[%s1839_s11 + $0x38] sm:$0xff]  ;;  %434 = vst [vmem:[#allocation3 + $0x30] sm:$0xff] %v1605_v16 }
  0x72   : > { %v323_v7 = vmul.f32 %v1872_v5, %v1872_v5  ;;  %v1879_v8 = vld [vmem:[%s1839_s11 + $0x28] sm:$0xff]  ;;  %v326_v11 = vmul.f32 %v1882_v9, %v1882_v9  ;;  %v1892_v13 = vld [vmem:[%s1839_s11 + $0x30] sm:$0xff]  ;;  %v329_v14 = vmul.f32 %v1889_v12, %v1889_v12  ;;  %435 = vst [vmem:[#allocation3] sm:$0xff] %v1605_v16  ;;  %436 = vst [vmem:[#allocation3 + $0x18] sm:$0xff] %v1605_v16 }
  0x73   : > { %334 = vadd.xlane.f32.xlu1 %v324_v3  ;;  %330 = vadd.xlane.f32.xlu0 %v322_v4  ;;  %v327_v10 = vmul.f32 %v1879_v8, %v1879_v8  ;;  %v328_v15 = vmul.f32 %v1892_v13, %v1892_v13  ;;  %437 = vst [vmem:[#allocation3 + $0x10] sm:$0xff] %v1605_v16  ;;  %438 = vst [vmem:[#allocation3 + $0x8] sm:$0xff] %v1605_v16  ;;  %v1060_v45 = vld [vmem:[%s2020_s1] ss:$0 sm:$0xff] }
  0x74   : > { %439 = vst [vmem:[#allocation3 + $0x20] sm:$0xff] %v1605_v16  ;;  %440 = vst [vmem:[#allocation3 + $0x28] sm:$0xff] %v1605_v16 }
  0x75   : > { %441 = vst [vmem:[#allocation3 + $0x38] sm:$0xff] %v1605_v16 }
  0x77   : > { %336 = vadd.xlane.f32.xlu1 %v325_v6  ;;  %332 = vadd.xlane.f32.xlu0 %v323_v7 }
  0x7b   : > { %340 = vadd.xlane.f32.xlu1 %v327_v10  ;;  %338 = vadd.xlane.f32.xlu0 %v326_v11 }
  0x7f   : > { %344 = vadd.xlane.f32.xlu1 %v329_v14  ;;  %342 = vadd.xlane.f32.xlu0 %v328_v15 }
  0xfc   : > { %v335_v17 = vpop.xlane.xlu1 %334  ;;  %v331_v18 = vpop.xlane.xlu0 %330 }
  0xfd   : > { %v349_v19 = vmul.f32 0.0078125, %v335_v17  ;;  %v347_v20 = vmul.f32 0.0078125, %v331_v18 }
  0xff   : > { %v357_v21 = vadd.f32 1e-05, %v349_v19  ;;  %v355_v22 = vadd.f32 1e-05, %v347_v20 }
 0x100   : > { %v337_v23 = vpop.xlane.xlu1 %336  ;;  %v333_v24 = vpop.xlane.xlu0 %332 }
 0x101   : > { %1303 = vrsqrt.f32 %v357_v21  ;;  %v350_v25 = vmul.f32 0.0078125, %v337_v23  ;;  %v348_v26 = vmul.f32 0.0078125, %v333_v24 }
 0x102   : > { %1305 = vrsqrt.f32 %v355_v22 }
 0x103   : > { %v358_v27 = vadd.f32 1e-05, %v350_v25  ;;  %v356_v28 = vadd.f32 1e-05, %v348_v26 }
 0x104   : > { %v341_v29 = vpop.xlane.xlu1 %340  ;;  %v339_v30 = vpop.xlane.xlu0 %338 }
 0x105   : > { %1307 = vrsqrt.f32 %v358_v27  ;;  %v352_v31 = vmul.f32 0.0078125, %v341_v29  ;;  %v351_v32 = vmul.f32 0.0078125, %v339_v30 }
 0x106   : > { %1309 = vrsqrt.f32 %v356_v28 }
 0x107   : > { %v360_v33 = vadd.f32 1e-05, %v352_v31  ;;  %v359_v34 = vadd.f32 1e-05, %v351_v32 }
 0x108   : > { %v345_v35 = vpop.xlane.xlu1 %344  ;;  %v343_v36 = vpop.xlane.xlu0 %342 }
 0x109   : > { %1311 = vrsqrt.f32 %v360_v33  ;;  %v354_v37 = vmul.f32 0.0078125, %v345_v35  ;;  %v353_v38 = vmul.f32 0.0078125, %v343_v36 }
 0x10a   : > { %1313 = vrsqrt.f32 %v359_v34 }
 0x10b   : > { %v362_v39 = vadd.f32 1e-05, %v354_v37  ;;  %v361_v40 = vadd.f32 1e-05, %v353_v38 }
 0x10d   : > { %1315 = vrsqrt.f32 %v362_v39 }
 0x10e   : > { %v1304_v41 = vpop.eup %1303  ;;  %1317 = vrsqrt.f32 %v361_v40 }
 0x10f   : > { %v1306_v42 = vpop.eup %1305  ;;  %v373_v43 = vmul.f32 %v1304_v41, %v1859_v0 }
 0x110   : > { %v371_v46 = vmul.f32 %v1306_v42, %v1862_v1 }
 0x111   : > { %v388_v50 = vmul.f32 %v1060_v45, %v373_v43 }
 0x112   : > { %v1308_v44 = vpop.eup %1307  ;;  %v386_v53 = vmul.f32 %v1060_v45, %v371_v46 }
 0x113   : > { %v1310_v47 = vpop.eup %1309  ;;  %v374_v48 = vmul.f32 %v1308_v44, %v1865_v2 }
 0x114   : > { %v372_v49 = vmul.f32 %v1310_v47, %v1872_v5 }
 0x115   : > { %v389_v51 = vmul.f32 %v1060_v45, %v374_v48 }
 0x116   : > { %v1312_v52 = vpop.eup %1311  ;;  %v387_v54 = vmul.f32 %v1060_v45, %v372_v49 }
 0x117   : > { %v1314_v55 = vpop.eup %1313  ;;  %v1131_v56 = vpack.c.bf16 %v389_v51, %v388_v50  ;;  %v376_v57 = vmul.f32 %v1312_v52, %v1879_v8 }
 0x118   : > { %v1126_v58 = vpack.c.bf16 %v387_v54, %v386_v53  ;;  %v375_v59 = vmul.f32 %v1314_v55, %v1882_v9 }
 0x119   : > { %1143 = vst [vmem:[#allocation2 + $0x8] sm:$0xff] %v1131_v56   ;;  %v391_v60 = vmul.f32 %v1060_v45, %v376_v57 }
 0x11a   : > { %v1316_v61 = vpop.eup %1315  ;;  %1127 = vst [vmem:[#allocation2] sm:$0xff] %v1126_v58   ;;  %v390_v62 = vmul.f32 %v1060_v45, %v375_v59 }
 0x11b   : > { %v1318_v63 = vpop.eup %1317  ;;  %v378_v0 = vmul.f32 %v1316_v61, %v1889_v12 }
 0x11c   : > { %v1136_v1 = vpack.c.bf16 %v391_v60, %v390_v62  ;;  %v377_v2 = vmul.f32 %v1318_v63, %v1892_v13 }
 0x11d   : > { %v393_v3 = vmul.f32 %v1060_v45, %v378_v0 }
 0x11e   : > { %1144 = vst [vmem:[#allocation2 + $0x10] sm:$0xff] %v1136_v1   ;;  %v392_v4 = vmul.f32 %v1060_v45, %v377_v2 }
 0x120   : > { %v1141_v5 = vpack.c.bf16 %v393_v3, %v392_v4 }
 0x122   : > { %1145 = vst [vmem:[#allocation2 + $0x18] sm:$0xff] %v1141_v5  }
 0x123 PF: > { %v1319_v6 = vld [vmem:[%s1847_s15 + $0x74] ss:$8 sps:$4 sm:$0xff]   ;;  %v1321_v7 = vld [vmem:[%s1847_s15 + $0x70] ss:$8 sps:$4 sm:$0xff]   ;;  %v1606_v8 = vmov 0   ;;  %v1343_v23 = vld [vmem:[#allocation2] sm:$0xff]  }
 0x124   : > { %602 = vmatprep.mubr.bf16.mxu0 %v1606_v8  ;;  %570 = vmatprep.subr.bf16.mxu0 %v1319_v6  ;;  %v1322_v9 = vld [vmem:[%s1847_s15 + $0x64] ss:$8 sps:$4 sm:$0xff]   ;;  %v1324_v10 = vld [vmem:[%s1847_s15 + $0x60] ss:$8 sps:$4 sm:$0xff]   ;;  %v1325_v11 = vld [vmem:[%s1847_s15 + $0x54] ss:$8 sps:$4 sm:$0xff]  }
 0x125   : > { %571 = vmatpush1.bf16.msra.mxu0 %v1321_v7  ;;  %v1327_v12 = vld [vmem:[%s1847_s15 + $0x50] ss:$8 sps:$4 sm:$0xff]   ;;  %v1328_v13 = vld [vmem:[%s1847_s15 + $0x44] ss:$8 sps:$4 sm:$0xff]   ;;  %v1330_v14 = vld [vmem:[%s1847_s15 + $0x40] ss:$8 sps:$4 sm:$0xff]  }
 0x126   : > { %572 = vmatprep.subr.bf16.mxu0 %v1322_v9  ;;  %v1331_v15 = vld [vmem:[%s1847_s15 + $0x34] ss:$8 sps:$4 sm:$0xff]   ;;  %v1333_v16 = vld [vmem:[%s1847_s15 + $0x30] ss:$8 sps:$4 sm:$0xff]   ;;  %v1334_v17 = vld [vmem:[%s1847_s15 + $0x24] ss:$8 sps:$4 sm:$0xff]  }
 0x127   : > { %v1336_v18 = vld [vmem:[%s1847_s15 + $0x20] ss:$8 sps:$4 sm:$0xff]   ;;  %v1337_v19 = vld [vmem:[%s1847_s15 + $0x14] ss:$8 sps:$4 sm:$0xff]   ;;  %v1339_v20 = vld [vmem:[%s1847_s15 + $0x10] ss:$8 sps:$4 sm:$0xff]  }
 0x128   : > { %v1340_v21 = vld [vmem:[%s1847_s15 + $0x4] ss:$8 sps:$4 sm:$0xff]   ;;  %v1342_v22 = vld [vmem:[%s1847_s15] ss:$8 sps:$4 sm:$0xff]   ;;  %v1345_v25 = vld [vmem:[#allocation2 + $0x10] sm:$0xff]   ;;  %p1105_p11 = scmp.ne.s32.totalorder %s1579_s21, 3 }
 0x129   : > { %573 = vmatpush1.bf16.msra.mxu0 %v1324_v10  ;;  %v1344_v24 = vld [vmem:[#allocation2 + $0x8] sm:$0xff]   ;;  %v1346_v26 = vld [vmem:[#allocation2 + $0x18] sm:$0xff]   ;;  %v1348_v28 = vld [vmem:[%s1853_s8 + $0x30] sm:$0xff]  }
 0x12a   : > { %574 = vmatprep.subr.bf16.mxu0 %v1325_v11  ;;  %v1347_v27 = vld [vmem:[%s1853_s8 + $0x38] sm:$0xff]   ;;  %v1349_v29 = vld [vmem:[%s1853_s8 + $0x28] sm:$0xff]   ;;  %v1350_v30 = vld [vmem:[%s1853_s8 + $0x20] sm:$0xff]  }
 0x12b   : > { %1158 = vmatprep.subr.bf16.mxu1 %v1347_v27  ;;  %v1351_v31 = vld [vmem:[%s1853_s8 + $0x18] sm:$0xff]   ;;  %v1352_v32 = vld [vmem:[%s1853_s8 + $0x10] sm:$0xff]   ;;  %v1353_v33 = vld [vmem:[%s1853_s8 + $0x8] sm:$0xff]  }
 0x12c   : > { %1159 = vmatpush3.bf16.msra.mxu1 %v1347_v27  ;;  %v1354_v34 = vld [vmem:[%s1853_s8] sm:$0xff]  }
 0x12d   : > { %575 = vmatpush1.bf16.msra.mxu0 %v1327_v12  ;;  %1160 = vmatprep.subr.bf16.mxu1 %v1348_v28 }
 0x12e   : > { %576 = vmatprep.subr.bf16.mxu0 %v1328_v13 }
 0x130   : > { %1161 = vmatpush3.bf16.msra.mxu1 %v1348_v28 }
 0x131   : > { %577 = vmatpush1.bf16.msra.mxu0 %v1330_v14  ;;  %1162 = vmatprep.subr.bf16.mxu1 %v1349_v29 }
 0x132   : > { %578 = vmatprep.subr.bf16.mxu0 %v1331_v15 }
 0x134   : > { %1163 = vmatpush3.bf16.msra.mxu1 %v1349_v29 }
 0x135   : > { %579 = vmatpush1.bf16.msra.mxu0 %v1333_v16  ;;  %1164 = vmatprep.subr.bf16.mxu1 %v1350_v30 }
 0x136   : > { %580 = vmatprep.subr.bf16.mxu0 %v1334_v17 }
 0x138   : > { %1165 = vmatpush3.bf16.msra.mxu1 %v1350_v30 }
 0x139   : > { %581 = vmatpush1.bf16.msra.mxu0 %v1336_v18  ;;  %1166 = vmatprep.subr.bf16.mxu1 %v1351_v31 }
 0x13a   : > { %582 = vmatprep.subr.bf16.mxu0 %v1337_v19 }
 0x13c   : > { %1167 = vmatpush3.bf16.msra.mxu1 %v1351_v31 }
 0x13d   : > { %583 = vmatpush1.bf16.msra.mxu0 %v1339_v20  ;;  %1168 = vmatprep.subr.bf16.mxu1 %v1352_v32 }
 0x13e   : > { %584 = vmatprep.subr.bf16.mxu0 %v1340_v21 }
 0x140   : > { %1169 = vmatpush3.bf16.msra.mxu1 %v1352_v32 }
 0x141   : > { %585 = vmatpush1.bf16.msra.mxu0 %v1342_v22  ;;  %1170 = vmatprep.subr.bf16.mxu1 %v1353_v33 }
 0x144   : > { %603 = vmatmul.mubr.bf16.vlgmr.msra.gmra.mxu0 %v1343_v23  ;;  %1171 = vmatpush3.bf16.msra.mxu1 %v1353_v33 }
 0x145   : > { %612 = vmatprep.mubr.bf16.mxu0 %v1606_v8  ;;  %1172 = vmatprep.subr.bf16.mxu1 %v1354_v34 }
 0x148   : > { %1173 = vmatpush3.bf16.msra.mxu1 %v1354_v34 }
 0x14c   : > { %613 = vmatmul.mubr.bf16.gmra.mxu0 %v1344_v24 }
 0x14d   : > { %622 = vmatprep.mubr.bf16.mxu0 %v1606_v8 }
 0x154   : > { %623 = vmatmul.mubr.bf16.gmra.mxu0 %v1345_v25 }
 0x155   : > { %632 = vmatprep.mubr.bf16.mxu0 %v1606_v8 }
 0x15c   : > { %633 = vmatmul.mubr.bf16.gmra.mxu0 %v1346_v26 }
 0x204   : > { %v604_v35 = vpop.f32.mrf.mxu0 }
 0x205   : > { %v1089_v36 = vmul.f32 -1.442695, %v604_v35 }
 0x206   : > { %v606_v37 = vpop.f32.mrf.mxu0 }
 0x207   : > { %1355 = vpow2.f32 %v1089_v36 }
 0x208   : > { %v608_v38 = vpop.f32.mrf.mxu0 }
 0x209   : > { %v1090_v39 = vmul.f32 -1.442695, %v608_v38 }
 0x20a   : > { %v610_v40 = vpop.f32.mrf.mxu0 }
 0x20b   : > { %1357 = vpow2.f32 %v1090_v39  ;;  %v709_v39 = vld [vmem:[#allocation3 + $0x18] sm:$0xff] }
 0x20c   : > { %v614_v41 = vpop.f32.mrf.mxu0 }
 0x20d   : > { %v1091_v42 = vmul.f32 -1.442695, %v614_v41 }
 0x20e   : > { %v616_v43 = vpop.f32.mrf.mxu0 }
 0x20f   : > { %1359 = vpow2.f32 %v1091_v42 }
 0x210   : > { %v618_v44 = vpop.f32.mrf.mxu0 }
 0x211   : > { %v1092_v45 = vmul.f32 -1.442695, %v618_v44 }
 0x212   : > { %v620_v46 = vpop.f32.mrf.mxu0 }
 0x213   : > { %1361 = vpow2.f32 %v1092_v45 }
 0x214   : > { %v1356_v47 = vpop.eup %1355  ;;  %v624_v48 = vpop.f32.mrf.mxu0 }
 0x215   : > { %v667_v49 = vadd.f32 1.0, %v1356_v47  ;;  %v1093_v50 = vmul.f32 -1.442695, %v624_v48  ;;  %v708_v47 = vld [vmem:[#allocation3] sm:$0xff] }
 0x216   : > { %v626_v51 = vpop.f32.mrf.mxu0 }
 0x217   : > { %1363 = vrcp.f32 %v667_v49 }
 0x218   : > { %v1358_v52 = vpop.eup %1357  ;;  %1365 = vpow2.f32 %v1093_v50  ;;  %v628_v53 = vpop.f32.mrf.mxu0 }
 0x219   : > { %v668_v54 = vadd.f32 1.0, %v1358_v52  ;;  %v1094_v55 = vmul.f32 -1.442695, %v628_v53 }
 0x21a   : > { %v630_v56 = vpop.f32.mrf.mxu0 }
 0x21b   : > { %1367 = vrcp.f32 %v668_v54 }
 0x21c   : > { %v1360_v57 = vpop.eup %1359  ;;  %1369 = vpow2.f32 %v1094_v55  ;;  %v634_v58 = vpop.f32.mrf.mxu0 }
 0x21d   : > { %v669_v59 = vadd.f32 1.0, %v1360_v57  ;;  %v1095_v60 = vmul.f32 -1.442695, %v634_v58 }
 0x21e   : > { %v636_v61 = vpop.f32.mrf.mxu0 }
 0x21f   : > { %1371 = vrcp.f32 %v669_v59  ;;  %v712_v59 = vld [vmem:[#allocation3 + $0x20] sm:$0xff] }
 0x220   : > { %v1362_v62 = vpop.eup %1361  ;;  %1373 = vpow2.f32 %v1095_v60  ;;  %v638_v63 = vpop.f32.mrf.mxu0 }
 0x221   : > { %v670_v0 = vadd.f32 1.0, %v1362_v62  ;;  %v1096_v1 = vmul.f32 -1.442695, %v638_v63 }
 0x223   : > { %1375 = vrcp.f32 %v670_v0 }
 0x224   : > { %v1364_v2 = vpop.eup %1363  ;;  %1377 = vpow2.f32 %v1096_v1 }
 0x225   : > { %v1366_v3 = vpop.eup %1365  ;;  %v691_v5 = vmul.f32 %v1364_v2, %v604_v35  ;;  %v640_v35 = vpop.f32.mrf.mxu0 }
 0x226   : > { %v671_v4 = vadd.f32 1.0, %v1366_v3 }
 0x227   : > { %v699_v10 = vmul.f32 %v691_v5, %v606_v37 }
 0x228   : > { %v1368_v6 = vpop.eup %1367  ;;  %1379 = vrcp.f32 %v671_v4 }
 0x229   : > { %v1370_v7 = vpop.eup %1369  ;;  %v692_v8 = vmul.f32 %v1368_v6, %v608_v38 }
 0x22a   : > { %v672_v9 = vadd.f32 1.0, %v1370_v7 }
 0x22b   : > { %v700_v11 = vmul.f32 %v692_v8, %v610_v40 }
 0x22c   : > { %v1372_v12 = vpop.eup %1371  ;;  %1381 = vrcp.f32 %v672_v9 }
 0x22d   : > { %v1374_v13 = vpop.eup %1373  ;;  %v715_v14 = vpack.c.bf16 %v700_v11, %v699_v10  ;;  %v693_v16 = vmul.f32 %v1372_v12, %v614_v41  ;;  %v707_v41 = vld [vmem:[#allocation3 + $0x30] sm:$0xff] }
 0x22e   : > { %v673_v15 = vadd.f32 1.0, %v1374_v13 }
 0x22f   : > { %1174 = vmatprep.mubr.bf16.mxu1 %v715_v14  ;;  %v701_v21 = vmul.f32 %v693_v16, %v616_v43 }
 0x230   : > { %v1376_v17 = vpop.eup %1375  ;;  %1383 = vrcp.f32 %v673_v15 }
 0x231   : > { %v1378_v18 = vpop.eup %1377  ;;  %v694_v19 = vmul.f32 %v1376_v17, %v618_v44  ;;  %v710_v44 = vld [vmem:[#allocation3 + $0x10] sm:$0xff] }
 0x232   : > { %v674_v20 = vadd.f32 1.0, %v1378_v18 }
 0x233   : > { %v702_v22 = vmul.f32 %v694_v19, %v620_v46 }
 0x234   : > { %1385 = vrcp.f32 %v674_v20 }
 0x235   : > { %v1380_v23 = vpop.eup %1379  ;;  %v716_v24 = vpack.c.bf16 %v702_v22, %v701_v21 }
 0x236   : > { %v695_v25 = vmul.f32 %v1380_v23, %v624_v48 }
 0x237   : > { %1175 = vmatmul.mubr.bf16.vlgmr.msra.gmra.mxu1 %v716_v24 }
 0x238   : > { %v703_v28 = vmul.f32 %v695_v25, %v626_v51  ;;  %v713_v51 = vld [vmem:[#allocation3 + $0x28] sm:$0xff] }
 0x239   : > { %v1382_v26 = vpop.eup %1381 }
 0x23a   : > { %v696_v27 = vmul.f32 %v1382_v26, %v628_v53  ;;  %v711_v53 = vld [vmem:[#allocation3 + $0x8] sm:$0xff] }
 0x23c   : > { %v704_v29 = vmul.f32 %v696_v27, %v630_v56  ;;  %v714_v56 = vld [vmem:[#allocation3 + $0x38] sm:$0xff] }
 0x23d   : > { %v1384_v30 = vpop.eup %1383 }
 0x23e   : > { %v717_v31 = vpack.c.bf16 %v704_v29, %v703_v28  ;;  %v697_v32 = vmul.f32 %v1384_v30, %v634_v58 }
 0x240   : > { %1178 = vmatprep.mubr.bf16.mxu1 %v717_v31  ;;  %v705_v36 = vmul.f32 %v697_v32, %v636_v61 }
 0x241   : > { %v1386_v33 = vpop.eup %1385 }
 0x242   : > { %v698_v34 = vmul.f32 %v1386_v33, %v638_v63 }
 0x244   : > { %v706_v37 = vmul.f32 %v698_v34, %v640_v35 }
 0x246   : > { %v718_v38 = vpack.c.bf16 %v706_v37, %v705_v36 }
 0x248   : > { %1179 = vmatmul.mubr.bf16.gmra.mxu1 %v718_v38 }
 0x2f7   : > { %v1176_v40 = vpop.f32.mrf.mxu1 }
 0x2f8   : > { %v850_v42 = vadd.f32 %v1176_v40, %v709_v39 }
 0x2f9   : > { %v817_v43 = vpop.f32.mrf.mxu1 }
 0x2fa   : > { %858 = vst [vmem:[#allocation3 + $0x18] sm:$0xff] %v850_v42  ;;  %v848_v45 = vadd.f32 %v817_v43, %v707_v41 }
 0x2fb   : > { %v1177_v46 = vpop.f32.mrf.mxu1 }
 0x2fc   : > { %856 = vst [vmem:[#allocation3 + $0x30] sm:$0xff] %v848_v45  ;;  %v851_v48 = vadd.f32 %v1177_v46, %v710_v44 }
 0x2fd   : > { %v820_v49 = vpop.f32.mrf.mxu1 }
 0x2fe   : > { %859 = vst [vmem:[#allocation3 + $0x10] sm:$0xff] %v851_v48  ;;  %v849_v50 = vadd.f32 %v820_v49, %v708_v47 }
 0x300   : > { %857 = vst [vmem:[#allocation3] sm:$0xff] %v849_v50 }
 0x308   : > { %v1180_v52 = vpop.f32.mrf.mxu1 }
 0x309   : > { %v854_v54 = vadd.f32 %v1180_v52, %v713_v51 }
 0x30a   : > { %v833_v55 = vpop.f32.mrf.mxu1 }
 0x30b   : > { %862 = vst [vmem:[#allocation3 + $0x28] sm:$0xff] %v854_v54  ;;  %v852_v57 = vadd.f32 %v833_v55, %v711_v53 }
 0x30c   : > { %v1181_v58 = vpop.f32.mrf.mxu1 }
 0x30d   : > { %860 = vst [vmem:[#allocation3 + $0x8] sm:$0xff] %v852_v57  ;;  %v855_v60 = vadd.f32 %v1181_v58, %v714_v56  ;;  %867 = sbr.rel (%p1105_p11) target bundleno = 796 (0x31c), region = 56 }
 0x30e   : > { %v836_v61 = vpop.f32.mrf.mxu1 }
 0x30f   : > { %863 = vst [vmem:[#allocation3 + $0x38] sm:$0xff] %v855_v60  ;;  %v853_v62 = vadd.f32 %v836_v61, %v712_v59 }
 0x311   : > { %861 = vst [vmem:[#allocation3 + $0x20] sm:$0xff] %v853_v62 }
 0x312   : > { %v868_v63 = vld [vmem:[%s1839_s11] sm:$0xff]  ;;  %v876_v0 = vld [vmem:[#allocation3 + $0x30] sm:$0xff]  ;;  %v869_v1 = vld [vmem:[%s1839_s11 + $0x8] sm:$0xff] }
 0x313   : > { %v884_v2 = vadd.f32 %v876_v0, %v868_v63  ;;  %v877_v3 = vld [vmem:[#allocation3] sm:$0xff]  ;;  %v870_v4 = vld [vmem:[%s1839_s11 + $0x10] sm:$0xff]  ;;  %v878_v5 = vld [vmem:[#allocation3 + $0x18] sm:$0xff] }
 0x314   : > { %v885_v6 = vadd.f32 %v877_v3, %v869_v1  ;;  %v886_v7 = vadd.f32 %v878_v5, %v870_v4  ;;  %v871_v8 = vld [vmem:[%s1839_s11 + $0x18] sm:$0xff]  ;;  %v879_v9 = vld [vmem:[#allocation3 + $0x10] sm:$0xff]  ;;  %v872_v10 = vld [vmem:[%s1839_s11 + $0x20] sm:$0xff] }
 0x315   : > { %892 = vst [vmem:[%s1855_s10] sm:$0xff] %v884_v2  ;;  %v887_v11 = vadd.f32 %v879_v9, %v871_v8  ;;  %v880_v12 = vld [vmem:[#allocation3 + $0x8] sm:$0xff]  ;;  %v874_v17 = vld [vmem:[%s1839_s11 + $0x30] sm:$0xff]  ;;  %v875_v19 = vld [vmem:[%s1839_s11 + $0x38] sm:$0xff] }
 0x316   : > { %v873_v13 = vld [vmem:[%s1839_s11 + $0x28] sm:$0xff]  ;;  %893 = vst [vmem:[%s1855_s10 + $0x8] sm:$0xff] %v885_v6  ;;  %894 = vst [vmem:[%s1855_s10 + $0x10] sm:$0xff] %v886_v7  ;;  %v888_v15 = vadd.f32 %v880_v12, %v872_v10  ;;  %v883_v21 = vld [vmem:[#allocation3 + $0x38] sm:$0xff] }
 0x317   : > { %v882_v18 = vld [vmem:[#allocation3 + $0x28] sm:$0xff]  ;;  %895 = vst [vmem:[%s1855_s10 + $0x18] sm:$0xff] %v887_v11  ;;  %v891_v22 = vadd.f32 %v883_v21, %v875_v19 }
 0x318   : > { %v881_v14 = vld [vmem:[#allocation3 + $0x20] sm:$0xff]  ;;  %v890_v20 = vadd.f32 %v882_v18, %v874_v17  ;;  %896 = vst [vmem:[%s1855_s10 + $0x20] sm:$0xff] %v888_v15 }
 0x319   : > { %v889_v16 = vadd.f32 %v881_v14, %v873_v13  ;;  %899 = vst [vmem:[%s1855_s10 + $0x38] sm:$0xff] %v891_v22 }
 0x31a   : > { %898 = vst [vmem:[%s1855_s10 + $0x30] sm:$0xff] %v890_v20 }
 0x31b   : > { %897 = vst [vmem:[%s1855_s10 + $0x28] sm:$0xff] %v889_v16 }
 0x31c PF: > { %s2065_s21 = sld [smem:[#allocation16_spill]]  ;;  %s914_s26 = sshll.u32 %s1855_s10, 4  ;;  %s1957_s26 = int_to_ptr.vmem [resolvable:$true] %s914_s26 }
 0x31d   : > { %s2067_s4 = sld [smem:[#allocation25_spill]]  ;;  %s901_s0 = scalar_lea.sflag [#allocation6], %s1835_s24 }
 0x31e   : > { %s1471_s9 = scalar_lea.vmem %s1957_s26, 1024  ;;  %s1607_s6 = smov [#allocation10]  }
 0x31f   : > { %p1472_p1 = scmp.ne.s32.totalorder %s1957_s26, %s1471_s9  ;;  %s1475_s11 = sshll.u32 %s1607_s6, 4  ;;  %s1476_s11 = int_to_ptr.vmem [resolvable:$false] %s1475_s11 }
 0x320   : > { %s1477_s17 = scalar_lea.vmem %s1476_s11, 2048  ;;  %p1478_p9 = scmp.lt.s32.totalorder %s1957_s26, %s1476_s11 }
 0x321   : > { %p1473_p10 = pnand %p1472_p1, %p1786_p0  ;;  %p1479_p5 = scmp.lt.s32.totalorder %s1477_s17, %s1471_s9 }
 0x322   : > { %s1122_s2 = sshll.u32 %s2065_s21, 10 }
 0x323   : > { %s1954_s22 = scalar_lea.hbm %s2067_s4, %s1122_s2  ;;  %p1474_p3 = pneg %p1473_p10 }
 0x324   : > { %p1480_p13 = por %p1479_p5, %p1478_p9 }
 0x326   : > { %p1481_p2 = pnand %p1480_p13, %p1474_p3 }
 0x328   : > { %1484 = shalt.err (!%p1481_p2)
}
 0x329   : > { %s1485_s14 = scalar_lea.hbm %s1954_s22, 1024  ;;  %s1489_s15 = scalar_lea.hbm %s2067_s4, 2048 }
 0x32a   : > { %p1486_p6 = scmp.ne.s32.totalorder %s1954_s22, %s1485_s14  ;;  %p1490_p8 = scmp.lt.s32.totalorder %s1954_s22, %s2067_s4 }
 0x32b   : > { %p1491_p7 = scmp.lt.s32.totalorder %s1489_s15, %s1485_s14 }
 0x32c   : > { %p1487_p12 = pnand %p1486_p6, %p1786_p0 }
 0x32d   : > { %p1492_p11 = por %p1491_p7, %p1490_p8 }
 0x32e   : > { %p1488_p4 = pneg %p1487_p12 }
 0x330   : > { %p1493_p1 = pnand %p1492_p11, %p1488_p4 }
 0x332   : > { %1496 = shalt.err (!%p1493_p1)
}
 0x333   : > { %s1608_s10 = smov 128   ;;  %s1609_s7 = smov 8  }
 0x334   : > { %1188 = dma.vmem_to_hbm [thread:$0]  (%p1786_p0), %s1957_s26, 1024, %s1954_s22, %s901_s0, %s1608_s10, %s1608_s10, %s1609_s7  }
 0x335 PF: > { %p1205_p10 = scmp.ge.s32.totalorder %s1595_s25, 2  ;;  %s929_s27 = sand.u32 1, %s1567_s18  }
 0x336   : > { %p2068_p3 = scmp.ne.s32.totalorder %s2057_s5, 0  ;;  %s930_s21 = scalar_lea.sflag [#allocation6], %s929_s27 }
 0x338   : > { %p1201_p9 = pnand %p1205_p10, %p2068_p3 }
 0x33a   : > { %p1202_p5 = pneg %p1201_p9 }
 0x33c   : > { %1550 = dma.done.wait (%p1202_p5), %s930_s21, 1024  }
 0x33d   : > { %1552 = vsyncadd (%p1202_p5), %s930_s21, 4294966272  ;;  %s23_s25 = sadd.s32 1, %s1595_s25   ;;  %s2069_s2 = sld [smem:[#allocation14_spill]] }
 0x33e   : > { %p20_p13 = scmp.ge.s32.totalorder %s23_s25, 10   ;;  %s2070_s17 = sld [smem:[#allocation19_spill]] }
 0x33f   : > { %s2071_s24 = sld [smem:[#allocation15_spill]]  ;;  %s2076_s15 = smov %s1559_s16 }
 0x340   : > { %s2072_s20 = sld [smem:[#allocation22_spill]]  ;;  %s2078_s18 = smov %s1571_s19 }
 0x341   : > { %s2073_s22 = sld [smem:[#allocation17_spill]]  ;;  %s2080_s21 = smov %s1587_s23 }
 0x342   : > { %s2074_s13 = sld [smem:[#allocation18_spill]] }
 0x343   : > { %s2075_s30 = sld [smem:[#allocation20_spill]]  ;;  %s2077_s16 = smov %s2069_s2 }
 0x345   : > { %s2079_s19 = smov %s2071_s24  ;;  %22 = sbr.rel (!%p20_p13) target bundleno = 15 (0xf), region = 113 }
 0x348   : > { %s2081_s23 = smov %s2074_s13 }
 0x349   : > { %s2082_s24 = smov %s2075_s30 }
 0x34a   :  { %935 = vsyncpa [#allocation5], 1 }
 0x34b   :  { %937 = vsyncpa [#allocation5 + $0x1], 1 }
 0x34c   :  { %938 = vsyncpa [#allocation8], 1 }
 0x34d   :  { %940 = vsyncpa [#allocation8 + $0x1], 1 }
 0x34e   :  { %941 = vsyncpa [#allocation6], 1 }
 0x34f   :  { %943 = vsyncpa [#allocation6 + $0x1], 1 }

</bundles_post_ra>
